<compile_context>
chip_gen: v5e
topology: v5e:2x2
jax: 0.10.0
libtpu: 0.0.40
codegen_flags: <defaults>
</compile_context>

<pallas_src>
import functools

import jax
import jax.numpy as jnp
from jax.experimental import pallas as pl
from jax.experimental.pallas import tpu as pltpu


_LANE = 128
_FUSED_VMEM_FACTOR = 8            # ~2x in + 2x out + f32 temporaries (conservative)
_TWO_PASS_BLOCK_BYTES = 4 << 20   # ~4 MiB x-block per grid step
_SPATIAL_TILE_CAP = 16384         # lanes per spatial tile (bounds stats unroll)


# ----------------------------- tile selection ------------------------------

def _vmem_limit_bytes():
    """Scoped-VMEM limit: ~3/4 of physical, capped at 96 MiB.

    v5e/v6e (128 MiB physical) -> 96 MiB; v7x (64 MiB physical) -> 48 MiB.
    """
    try:
        cap = int(pltpu.get_tpu_info().vmem_capacity_bytes)
    except Exception:
        cap = 0
    if cap <= 0:
        cap = 64 << 20
    return min(cap * 3 // 4, 96 << 20)


def _valid_channel_tiles(C):
    """Channel tiles legal as a second-to-last block dim: the full C, or any
    multiple-of-8 divisor of C.  Returned in descending order."""
    tiles = {C}
    t = 8
    while t < C:
        if C % t == 0:
            tiles.add(t)
        t += 8
    return sorted(tiles, reverse=True)


def _pick_two_pass_tiles(C, HW, itemsize):
    """(c_blk, t_hw) for the two-pass kernels, sized by a byte budget."""
    # Spatial tile: largest multiple of 128 that divides HW (capped); else full HW.
    t_hw = None
    t = _LANE
    while t <= min(HW, _SPATIAL_TILE_CAP):
        if HW % t == 0:
            t_hw = t
        t += _LANE
    if t_hw is None:
        t_hw = HW
    # Channel tile: largest legal tile keeping the x-block under the byte budget.
    c_blk = None
    for c in _valid_channel_tiles(C):            # descending
        if c * t_hw * itemsize <= _TWO_PASS_BLOCK_BYTES:
            c_blk = c
            break
    if c_blk is None:
        c_blk = _valid_channel_tiles(C)[-1]      # smallest legal tile
    return c_blk, t_hw


# ------------------------------- kernels -----------------------------------

def _bn_fused_kernel(x_ref, w_ref, b_ref, y_ref, mean_ref, var_ref, *,
                     eps, inv_count):
    """Single-pass BN over a VMEM-resident (N, c_blk, HW) slab."""
    x = x_ref[...].astype(jnp.float32)                           # (N, c_blk, HW)
    xs = jnp.sum(x, axis=0)                                      # (c_blk, HW)
    mean = jnp.sum(xs, axis=-1, keepdims=True) * inv_count       # (c_blk, 1)
    centered = x - mean[None]
    var = jnp.sum(jnp.sum(centered * centered, axis=0),
                  axis=-1, keepdims=True) * inv_count            # (c_blk, 1)
    scale = w_ref[...] * jax.lax.rsqrt(var + eps)                # (c_blk, 1)
    y_ref[...] = (centered * scale[None] + b_ref[...][None]).astype(y_ref.dtype)
    mean_ref[...] = mean
    var_ref[...] = var


def _bn_stats_kernel(x_ref, sum_ref, sumsq_ref):
    """Accumulate per-channel lane-wide partial sum / sum-of-squares.

    x_ref:   (c_blk, t_hw)       (batch dim squeezed away by the BlockSpec)
    sum_ref / sumsq_ref: (c_blk, 128) f32, resident across the (n, s) axes.
    """
    n = pl.program_id(1)
    s = pl.program_id(2)

    @pl.when((n == 0) & (s == 0))
    def _():
        sum_ref[...] = jnp.zeros_like(sum_ref)
        sumsq_ref[...] = jnp.zeros_like(sumsq_ref)

    x = x_ref[...].astype(jnp.float32)
    c_blk, t_hw = x.shape
    psum = jnp.zeros((c_blk, _LANE), jnp.float32)
    psq = jnp.zeros((c_blk, _LANE), jnp.float32)
    n_full = t_hw // _LANE
    for k in range(n_full):                       # static unroll, lane-aligned slices
        chunk = x[:, k * _LANE:(k + 1) * _LANE]
        psum = psum + chunk
        psq = psq + chunk * chunk
    rem = t_hw - n_full * _LANE
    if rem:                                       # only when HW is not 128-divisible
        tail = x[:, n_full * _LANE:]
        tail = jnp.concatenate(
            [tail, jnp.zeros((c_blk, _LANE - rem), jnp.float32)], axis=-1)
        psum = psum + tail
        psq = psq + tail * tail
    sum_ref[...] += psum
    sumsq_ref[...] += psq


def _bn_apply_kernel(x_ref, scale_ref, shift_ref, y_ref):
    """y = x * scale + shift (per-channel scale/shift broadcast over lanes)."""
    x = x_ref[...].astype(jnp.float32)
    y_ref[...] = (x * scale_ref[...] + shift_ref[...]).astype(y_ref.dtype)


# ------------------------------- wrappers -----------------------------------

def _batch_norm_fused(x3, w_c, b_c, eps, c_blk, vmem_limit):
    N, C, HW = x3.shape
    kernel = functools.partial(_bn_fused_kernel, eps=float(eps),
                               inv_count=1.0 / float(N * HW))
    y3, mean_c1, var_c1 = pl.pallas_call(
        kernel,
        grid=(C // c_blk,),
        in_specs=[
            pl.BlockSpec((N, c_blk, HW), lambda c: (0, c, 0)),
            pl.BlockSpec((c_blk, 1), lambda c: (c, 0)),
            pl.BlockSpec((c_blk, 1), lambda c: (c, 0)),
        ],
        out_specs=(
            pl.BlockSpec((N, c_blk, HW), lambda c: (0, c, 0)),
            pl.BlockSpec((c_blk, 1), lambda c: (c, 0)),
            pl.BlockSpec((c_blk, 1), lambda c: (c, 0)),
        ),
        out_shape=(
            jax.ShapeDtypeStruct((N, C, HW), x3.dtype),
            jax.ShapeDtypeStruct((C, 1), jnp.float32),
            jax.ShapeDtypeStruct((C, 1), jnp.float32),
        ),
        compiler_params=pltpu.CompilerParams(
            dimension_semantics=("parallel",),
            vmem_limit_bytes=vmem_limit),
    )(x3, w_c.reshape(C, 1).astype(jnp.float32),
      b_c.reshape(C, 1).astype(jnp.float32))
    return y3, mean_c1[:, 0], var_c1[:, 0]


def _batch_norm_stats(x3, c_blk, t_hw, vmem_limit):
    """Per-channel (C, 128) lane-wide partial sum(x) and sum(x*x)."""
    N, C, HW = x3.shape
    grid = (C // c_blk, N, HW // t_hw)
    sum_c, sumsq_c = pl.pallas_call(
        _bn_stats_kernel,
        grid=grid,
        in_specs=[pl.BlockSpec((pl.Squeezed(), c_blk, t_hw),
                               lambda c, n, s: (n, c, s))],
        out_specs=(pl.BlockSpec((c_blk, _LANE), lambda c, n, s: (c, 0)),
                   pl.BlockSpec((c_blk, _LANE), lambda c, n, s: (c, 0))),
        out_shape=(jax.ShapeDtypeStruct((C, _LANE), jnp.float32),
                   jax.ShapeDtypeStruct((C, _LANE), jnp.float32)),
        compiler_params=pltpu.CompilerParams(
            dimension_semantics=("parallel", "arbitrary", "arbitrary"),
            vmem_limit_bytes=vmem_limit),
    )(x3)
    return jnp.sum(sum_c, axis=-1), jnp.sum(sumsq_c, axis=-1)


def _batch_norm_apply(x3, scale_c, shift_c, c_blk, t_hw, vmem_limit):
    """y = x * scale[c] + shift[c] over the (N, C, HW) view."""
    N, C, HW = x3.shape
    grid = (C // c_blk, N, HW // t_hw)
    return pl.pallas_call(
        _bn_apply_kernel,
        grid=grid,
        in_specs=[
            pl.BlockSpec((pl.Squeezed(), c_blk, t_hw), lambda c, n, s: (n, c, s)),
            pl.BlockSpec((c_blk, 1), lambda c, n, s: (c, 0)),
            pl.BlockSpec((c_blk, 1), lambda c, n, s: (c, 0)),
        ],
        out_specs=pl.BlockSpec((pl.Squeezed(), c_blk, t_hw),
                               lambda c, n, s: (n, c, s)),
        out_shape=jax.ShapeDtypeStruct((N, C, HW), x3.dtype),
        compiler_params=pltpu.CompilerParams(
            dimension_semantics=("parallel", "parallel", "parallel"),
            vmem_limit_bytes=vmem_limit),
    )(x3, scale_c.reshape(C, 1).astype(jnp.float32),
      shift_c.reshape(C, 1).astype(jnp.float32))


def custom_batch_norm_forward(x, weight, bias, running_mean, running_var,
                              eps, training, force_two_pass=False):
    """Forward pass of CustomBatchNorm on NCHW input.

    Returns (y, batch_mean, batch_var). In eval mode mean/var are the running
    statistics that were used.
    """
    N, C, H, W = x.shape
    HW = H * W
    x3 = x.reshape(N, C, HW)               # free reshape, no data movement
    vmem_limit = _vmem_limit_bytes()

    w = weight if weight is not None else jnp.ones((C,), jnp.float32)
    b = bias if bias is not None else jnp.zeros((C,), jnp.float32)

    if training:
        # --- preferred: fused single-pass (1 read + 1 write of the tensor) ---
        fused_c_blk = None
        if not force_two_pass:
            per_ch_f32 = N * HW * 4
            fits = [c for c in _valid_channel_tiles(C)
                    if _FUSED_VMEM_FACTOR * c * per_ch_f32 <= vmem_limit]
            if fits:
                fused_c_blk = fits[0]
                for c in fits:           # prefer >=2 channel blocks (v7x megacore)
                    if C // c >= 2 and c * per_ch_f32 >= (1 << 20):
                        fused_c_blk = c
                        break
        if fused_c_blk is not None:
            y3, mean, var = _batch_norm_fused(x3, w, b, eps, fused_c_blk,
                                              vmem_limit)
            return y3.reshape(N, C, H, W), mean, var

        # --- fallback: two-pass (slab does not fit VMEM) ---
        c_blk, t_hw = _pick_two_pass_tiles(C, HW, x.dtype.itemsize)
        s, ss = _batch_norm_stats(x3, c_blk, t_hw, vmem_limit)
        count = float(N * HW)
        mean = s / count
        # TODO(synk): E[x^2]-mean^2 can lose precision when |mean| >> std; a
        # shifted / Welford-style accumulation would fix it at extra cost.
        var = jnp.maximum(ss / count - mean * mean, 0.0)   # biased (unbiased=False)
    else:
        if running_mean is None or running_var is None:
            # The reference module dereferences running stats in eval mode, so
            # eval + track_running_stats=False is unsupported there as well.
            raise ValueError("eval mode requires running statistics")
        mean = running_mean.astype(jnp.float32)
        var = running_var.astype(jnp.float32)
        c_blk, t_hw = _pick_two_pass_tiles(C, HW, x.dtype.itemsize)

    inv_std = jax.lax.rsqrt(var + eps)
    scale = w.astype(jnp.float32) * inv_std
    shift = b.astype(jnp.float32) - mean * scale
    y3 = _batch_norm_apply(x3, scale, shift, c_blk, t_hw, vmem_limit)
    return y3.reshape(N, C, H, W), mean, var


# ------------------------------- module -------------------------------------

class CustomBatchNormPallas:
    """Mirrors the PyTorch CustomBatchNorm forward (training + eval)."""

    def __init__(self, num_features, eps=1e-5, momentum=0.1, affine=True,
                 track_running_stats=True):
        self.num_features = num_features
        self.eps = eps
        self.momentum = momentum
        self.affine = affine
        self.track_running_stats = track_running_stats
        # reset_parameters(): weight=1, bias=0, running_mean=0, running_var=1
        self.weight = jnp.ones((num_features,), jnp.float32) if affine else None
        self.bias = jnp.zeros((num_features,), jnp.float32) if affine else None
        if track_running_stats:
            self.running_mean = jnp.zeros((num_features,), jnp.float32)
            self.running_var = jnp.ones((num_features,), jnp.float32)
            self.num_batches_tracked = 0
        else:
            self.running_mean = None
            self.running_var = None
            self.num_batches_tracked = None
        self.training = True

    def __call__(self, x):
        if self.training and self.track_running_stats:
            self.num_batches_tracked += 1

        y, mean, var = custom_batch_norm_forward(
            x, self.weight, self.bias, self.running_mean, self.running_var,
            eps=self.eps, training=self.training)

        if self.training and self.track_running_stats:
            m = self.momentum
            # The reference module uses the biased variance for the EMA too.
            self.running_mean = (1 - m) * self.running_mean + m * mean
            self.running_var = (1 - m) * self.running_var + m * var
        return y


# ------------------------------- self-test ----------------------------------

def _reference_train(x, weight, bias, eps):
    mean = jnp.mean(x, axis=(0, 2, 3), keepdims=True)
    var = jnp.mean((x - mean) ** 2, axis=(0, 2, 3), keepdims=True)
    xn = (x - mean) / jnp.sqrt(var + eps)
    return xn * weight.reshape(1, -1, 1, 1) + bias.reshape(1, -1, 1, 1)


if __name__ == "__main__":
    key = jax.random.PRNGKey(0)
    N, C, H, W = 2, 4, 16, 16
    x = jax.random.normal(key, (N, C, H, W), dtype=jnp.float32) * 2.0 + 0.5

    bn = CustomBatchNormPallas(num_features=C)

    # training-mode forward (fused single-pass path)
    y = jax.block_until_ready(bn(x))
    y_ref = _reference_train(x, bn.weight, bn.bias, bn.eps)
    assert y.shape == x.shape and y.dtype == x.dtype
    assert jnp.allclose(y, y_ref, atol=1e-5, rtol=1e-5), "fused train mismatch"

    # two-pass fallback path (stats kernel + apply kernel)
    y2, m2, v2 = custom_batch_norm_forward(
        x, bn.weight, bn.bias, None, None, eps=bn.eps, training=True,
        force_two_pass=True)
    y2 = jax.block_until_ready(y2)
    assert jnp.allclose(y2, y_ref, atol=1e-5, rtol=1e-5), "two-pass mismatch"

    # running-stat EMA (biased variance, as in the reference module)
    mean_ref = jnp.mean(x, axis=(0, 2, 3))
    var_ref = jnp.mean((x - mean_ref.reshape(1, -1, 1, 1)) ** 2, axis=(0, 2, 3))
    assert jnp.allclose(m2, mean_ref, atol=1e-5, rtol=1e-5)
    assert jnp.allclose(v2, var_ref, atol=1e-5, rtol=1e-5)
    assert bn.num_batches_tracked == 1
    assert jnp.allclose(bn.running_mean, 0.1 * mean_ref, atol=1e-5, rtol=1e-5)
    assert jnp.allclose(bn.running_var, 0.9 + 0.1 * var_ref, atol=1e-5, rtol=1e-5)

    # eval-mode forward (normalize with running stats; apply pass only)
    bn.training = False
    y_eval = jax.block_until_ready(bn(x))
    rm = bn.running_mean.reshape(1, -1, 1, 1)
    rv = bn.running_var.reshape(1, -1, 1, 1)
    y_eval_ref = ((x - rm) / jnp.sqrt(rv + bn.eps)
                  * bn.weight.reshape(1, -1, 1, 1) + bn.bias.reshape(1, -1, 1, 1))
    assert jnp.allclose(y_eval, y_eval_ref, atol=1e-5, rtol=1e-5), "eval mismatch"

    print("KERNEL_OK")
</pallas_src>

<mosaic_0001>
module attributes {stable_mosaic.version = 11 : i64} {
  func.func @_bn_fused_kernel(%arg0: i32, %arg1: memref<2x4x256xf32, #tpu.memory_space<vmem>>, %arg2: memref<4x1xf32, #tpu.memory_space<vmem>>, %arg3: memref<4x1xf32, #tpu.memory_space<vmem>>, %arg4: memref<2x4x256xf32, #tpu.memory_space<vmem>>, %arg5: memref<4x1xf32, #tpu.memory_space<vmem>>, %arg6: memref<4x1xf32, #tpu.memory_space<vmem>>) attributes {dimension_semantics = [#tpu.dimension_semantics<parallel>], iteration_bounds = array<i64: 1>, scalar_prefetch = 0 : i64, scratch_operands = 0 : i64, tpu.core_type = #tpu.core_type<tc>, window_params = [{transform_indices = @transform_0, window_bounds = array<i64: 2, 4, 256>}, {transform_indices = @transform_1, window_bounds = array<i64: 4, 1>}, {transform_indices = @transform_2, window_bounds = array<i64: 4, 1>}, {transform_indices = @transform_3, window_bounds = array<i64: 2, 4, 256>}, {transform_indices = @transform_4, window_bounds = array<i64: 4, 1>}, {transform_indices = @transform_5, window_bounds = array<i64: 4, 1>}]} {
    %c0 = arith.constant 0 : index
    %c0_0 = arith.constant 0 : index
    %c0_1 = arith.constant 0 : index
    %0 = vector.load %arg1[%c0, %c0_0, %c0_1] : memref<2x4x256xf32, #tpu.memory_space<vmem>>, vector<2x4x256xf32>
    %cst = arith.constant dense<0.000000e+00> : vector<4x256xf32>
    %1 = vector.multi_reduction <add>, %0, %cst [0] : vector<2x4x256xf32> to vector<4x256xf32>
    %cst_2 = arith.constant dense<0.000000e+00> : vector<4xf32>
    %2 = vector.multi_reduction <add>, %1, %cst_2 [1] : vector<4x256xf32> to vector<4xf32>
    %3 = vector.shape_cast %2 : vector<4xf32> to vector<4x1xf32>
    %cst_3 = arith.constant 0.001953125 : f32
    %4 = vector.broadcast %cst_3 : f32 to vector<4x1xf32>
    %5 = arith.mulf %3, %4 : vector<4x1xf32>
    %6 = vector.shape_cast %5 : vector<4x1xf32> to vector<1x4x1xf32>
    %7 = vector.broadcast %6 : vector<1x4x1xf32> to vector<2x4x256xf32>
    %8 = arith.subf %0, %7 : vector<2x4x256xf32>
    %9 = arith.mulf %8, %8 : vector<2x4x256xf32>
    %cst_4 = arith.constant dense<0.000000e+00> : vector<4x256xf32>
    %10 = vector.multi_reduction <add>, %9, %cst_4 [0] : vector<2x4x256xf32> to vector<4x256xf32>
    %cst_5 = arith.constant dense<0.000000e+00> : vector<4xf32>
    %11 = vector.multi_reduction <add>, %10, %cst_5 [1] : vector<4x256xf32> to vector<4xf32>
    %12 = vector.shape_cast %11 : vector<4xf32> to vector<4x1xf32>
    %cst_6 = arith.constant 0.001953125 : f32
    %13 = vector.broadcast %cst_6 : f32 to vector<4x1xf32>
    %14 = arith.mulf %12, %13 : vector<4x1xf32>
    %c0_7 = arith.constant 0 : index
    %c0_8 = arith.constant 0 : index
    %15 = vector.load %arg2[%c0_7, %c0_8] : memref<4x1xf32, #tpu.memory_space<vmem>>, vector<4x1xf32>
    %cst_9 = arith.constant 9.99999974E-6 : f32
    %16 = vector.broadcast %cst_9 : f32 to vector<4x1xf32>
    %17 = arith.addf %14, %16 : vector<4x1xf32>
    %18 = math.rsqrt %17 : vector<4x1xf32>
    %19 = arith.mulf %15, %18 : vector<4x1xf32>
    %20 = vector.shape_cast %19 : vector<4x1xf32> to vector<1x4x1xf32>
    %21 = vector.broadcast %20 : vector<1x4x1xf32> to vector<2x4x256xf32>
    %22 = arith.mulf %8, %21 : vector<2x4x256xf32>
    %c0_10 = arith.constant 0 : index
    %c0_11 = arith.constant 0 : index
    %23 = vector.load %arg3[%c0_10, %c0_11] : memref<4x1xf32, #tpu.memory_space<vmem>>, vector<4x1xf32>
    %24 = vector.shape_cast %23 : vector<4x1xf32> to vector<1x4x1xf32>
    %25 = vector.broadcast %24 : vector<1x4x1xf32> to vector<2x4x256xf32>
    %26 = arith.addf %22, %25 : vector<2x4x256xf32>
    %c0_12 = arith.constant 0 : index
    %c0_13 = arith.constant 0 : index
    %c0_14 = arith.constant 0 : index
    %27 = vector.load %arg4[%c0_12, %c0_13, %c0_14] : memref<2x4x256xf32, #tpu.memory_space<vmem>>, vector<2x4x256xf32>
    tpu.vector_store %arg4[%c0_12, %c0_13, %c0_14], %26 {strides = array<i32>} : memref<2x4x256xf32, #tpu.memory_space<vmem>>, vector<2x4x256xf32>,
    %c0_15 = arith.constant 0 : index
    %c0_16 = arith.constant 0 : index
    %28 = vector.load %arg5[%c0_15, %c0_16] : memref<4x1xf32, #tpu.memory_space<vmem>>, vector<4x1xf32>
    tpu.vector_store %arg5[%c0_15, %c0_16], %5 {strides = array<i32>} : memref<4x1xf32, #tpu.memory_space<vmem>>, vector<4x1xf32>,
    %c0_17 = arith.constant 0 : index
    %c0_18 = arith.constant 0 : index
    %29 = vector.load %arg6[%c0_17, %c0_18] : memref<4x1xf32, #tpu.memory_space<vmem>>, vector<4x1xf32>
    tpu.vector_store %arg6[%c0_17, %c0_18], %14 {strides = array<i32>} : memref<4x1xf32, #tpu.memory_space<vmem>>, vector<4x1xf32>,
    return
  }
  func.func @transform_0(%arg0: i32) -> (i32, i32, i32) {
    %c0_i32 = arith.constant 0 : i32
    %c0_i32_0 = arith.constant 0 : i32
    %c0_i32_1 = arith.constant 0 : i32
    return %c0_i32, %arg0, %c0_i32_0 : i32, i32, i32
  }
  func.func @transform_1(%arg0: i32) -> (i32, i32) {
    %c0_i32 = arith.constant 0 : i32
    %c0_i32_0 = arith.constant 0 : i32
    return %arg0, %c0_i32 : i32, i32
  }
  func.func @transform_2(%arg0: i32) -> (i32, i32) {
    %c0_i32 = arith.constant 0 : i32
    %c0_i32_0 = arith.constant 0 : i32
    return %arg0, %c0_i32 : i32, i32
  }
  func.func @transform_3(%arg0: i32) -> (i32, i32, i32) {
    %c0_i32 = arith.constant 0 : i32
    %c0_i32_0 = arith.constant 0 : i32
    %c0_i32_1 = arith.constant 0 : i32
    return %c0_i32, %arg0, %c0_i32_0 : i32, i32, i32
  }
  func.func @transform_4(%arg0: i32) -> (i32, i32) {
    %c0_i32 = arith.constant 0 : i32
    %c0_i32_0 = arith.constant 0 : i32
    return %arg0, %c0_i32 : i32, i32
  }
  func.func @transform_5(%arg0: i32) -> (i32, i32) {
    %c0_i32 = arith.constant 0 : i32
    %c0_i32_0 = arith.constant 0 : i32
    return %arg0, %c0_i32 : i32, i32
  }
}

</mosaic_0001>

<bundles_post_ra>
// kernel: tpu_custom_call.1
= control target key start
LH: loop header
LB: loop body
LE: loop exit
PB: predicated region body
PF: predicated region fallthrough
CT: control target
= control target key end

     0   :  { %11 = vsyncpa [#allocation3], 0  ;;  %s301_s0 = inlined_call_operand.hbm [shape: f32[2,4,256], index: 0, kind: input, shape index: {}]   ;;  %s302_s1 = inlined_call_operand.vmem [shape: f32[4,1], index: 1, kind: input, shape index: {}]   ;;  %s303_s2 = inlined_call_operand.vmem [shape: f32[4,1], index: 2, kind: input, shape index: {}]   ;;  %s304_s3 = inlined_call_operand.hbm [shape: f32[2,4,256], index: 3, kind: output, shape index: {0}]   ;;  %s305_s4 = inlined_call_operand.vmem [shape: f32[4,1], index: 4, kind: output, shape index: {1}]   ;;  %s306_s5 = inlined_call_operand.vmem [shape: f32[4,1], index: 5, kind: output, shape index: {2}]  }
   0x1   :  { %12 = vsyncpa [#allocation4], 0  ;;  %s17_s20 = sshll.u32 %s301_s0, 4  ;;  %s227_s21 = smov [#allocation2]   ;;  %s18_s20 = int_to_ptr.hbm [resolvable:$true] %s17_s20 }
   0x2   :  { %s19_s22 = sshll.u32 %s227_s21, 4  ;;  %s228_s23 = smov 128   ;;  %s20_s22 = int_to_ptr.vmem [resolvable:$true] %s19_s22 }
   0x3   :  { %s229_s24 = smov 8  }
   0x4   :  { %25 = dma.hbm_to_vmem [thread:$0]  %s18_s20, 256, %s20_s22, [#allocation3], %s228_s23, %s228_s23, %s229_s24  }
   0x5   :  { %223 = dma.done.wait [#allocation3], 256  }
   0x6   :  { %224 = vsyncadd [#allocation3], 4294967040  ;;  %v34_v0 = vld [vmem:[#allocation2] sm:$0xff]  ;;  %v35_v1 = vld [vmem:[#allocation2 + $0x8] sm:$0xff]  ;;  %vm49_vm0 = vcmask 1043456   ;;  %vm135_vm1 = vcmask 3072  }
   0x7   :  { %38 = vst [vmem:[#allocation1] ss:$2 sm:$0xff] %v34_v0  ;;  %v230_v15 = vmov 839922192   ;;  %v231_v38 = vmov 0   ;;  %s144_s8 = sshll.u32 %s304_s3, 4  ;;  %s145_s8 = int_to_ptr.hbm [resolvable:$true] %s144_s8 }
   0x8   :  { %42 = vst [vmem:[#allocation1 + $0x10] ss:$2 sm:$0xff] %v35_v1  ;;  %v64_v16 = vunpack.c.l.s4 %v230_v15  ;;  %171 = vset.pattern.permute.xlu1 %v231_v38  ;;  %172 = vset.pattern.permute.xlu0 %v231_v38  ;;  %v97_v47 = vld [vmem:[%s302_s1] sm:$0xf] }
   0x9   :  { %v121_v51 = vld [vmem:[%s303_s2] sm:$0xf] }
   0xa   :  { %v65_v17 = vunpack.c.0.s8 %v64_v16 }
   0xe   :  { %v39_v2 = vld.sshfl [vmem:[#allocation1] sm:$0xff pattern:$0x75316420]  ;;  %v40_v3 = vld.sshfl [vmem:[#allocation1 + $0x8] sm:$0xff pattern:$0x75316420] }
   0xf   :  { %v43_v4 = vld.sshfl [vmem:[#allocation1 + $0x10] sm:$0xff pattern:$0x75316420]  ;;  %v44_v5 = vld.sshfl [vmem:[#allocation1 + $0x18] sm:$0xff pattern:$0x75316420] }
  0x10   :  { %v50_v6 = vsel %vm49_vm0, %v39_v2, 0.0  ;;  %v51_v7 = vsel %vm49_vm0, %v43_v4, 0.0  ;;  %v53_v8 = vsel %vm49_vm0, %v40_v3, 0.0  ;;  %v54_v9 = vsel %vm49_vm0, %v44_v5, 0.0 }
  0x11   :  { %v52_v10 = vadd.f32 %v51_v7, %v50_v6  ;;  %v55_v11 = vadd.f32 %v54_v9, %v53_v8 }
  0x13   :  { %v56_v12 = vsel %vm49_vm0, %v52_v10, 0.0  ;;  %v57_v13 = vsel %vm49_vm0, %v55_v11, 0.0 }
  0x14   :  { %v58_v14 = vadd.f32 %v57_v13, %v56_v12 }
  0x16   :  { %59 = vadd.xlane.f32.xlu0 %v58_v14 }
  0x89   :  { %v60_v18 = vpop.xlane.xlu0 %59 }
  0x8a   :  { %v61_v19 = vmul.f32 0.001953125, %v60_v18 }
  0x8c   :  { %v66_v20 = vperm.slane %v61_v19, %v65_v17  ;;  %136 = vst.msk [vmem:[%s305_s4] sm:$0xf] %vm135_vm1, %v61_v19 }
  0x8e   :  { %v68_v21 = vsub.f32 %v34_v0, %v66_v20  ;;  %v69_v22 = vsub.f32 %v35_v1, %v66_v20 }
  0x90   :  { %v70_v23 = vmul.f32 %v68_v21, %v68_v21  ;;  %v71_v24 = vmul.f32 %v69_v22, %v69_v22 }
  0x92   :  { %74 = vst [vmem:[#allocation1] ss:$2 sm:$0xff] %v70_v23 }
  0x93   :  { %78 = vst [vmem:[#allocation1 + $0x10] ss:$2 sm:$0xff] %v71_v24 }
  0x99   :  { %v75_v25 = vld.sshfl [vmem:[#allocation1] sm:$0xff pattern:$0x75316420]  ;;  %v76_v26 = vld.sshfl [vmem:[#allocation1 + $0x8] sm:$0xff pattern:$0x75316420] }
  0x9a   :  { %v79_v27 = vld.sshfl [vmem:[#allocation1 + $0x10] sm:$0xff pattern:$0x75316420]  ;;  %v80_v28 = vld.sshfl [vmem:[#allocation1 + $0x18] sm:$0xff pattern:$0x75316420] }
  0x9b   :  { %v85_v29 = vsel %vm49_vm0, %v75_v25, 0.0  ;;  %v86_v30 = vsel %vm49_vm0, %v79_v27, 0.0  ;;  %v88_v31 = vsel %vm49_vm0, %v76_v26, 0.0  ;;  %v89_v32 = vsel %vm49_vm0, %v80_v28, 0.0 }
  0x9c   :  { %v87_v33 = vadd.f32 %v86_v30, %v85_v29  ;;  %v90_v34 = vadd.f32 %v89_v32, %v88_v31 }
  0x9e   :  { %v91_v35 = vsel %vm49_vm0, %v87_v33, 0.0  ;;  %v92_v36 = vsel %vm49_vm0, %v90_v34, 0.0 }
  0x9f   :  { %v93_v37 = vadd.f32 %v92_v36, %v91_v35 }
  0xa1   :  { %94 = vadd.xlane.f32.xlu0 %v93_v37 }
 0x114   :  { %v95_v39 = vpop.xlane.xlu0 %94 }
 0x115   :  { %v96_v40 = vmul.f32 0.001953125, %v95_v39 }
 0x117   :  { %v98_v41 = vadd.f32 1e-05, %v96_v40  ;;  %137 = vst.msk [vmem:[%s306_s5] sm:$0xf] %vm135_vm1, %v96_v40  ;;  %s232_s5 = smov [#allocation5]  }
 0x118   :  { %s142_s6 = sshll.u32 %s232_s5, 4  ;;  %s143_s6 = int_to_ptr.vmem [resolvable:$true] %s142_s6 }
 0x119   :  { %173 = vrsqrt.f32 %v98_v41  ;;  %vm105_vm3 = vweird.f32 %v98_v41 }
 0x11f   :  { %v174_v42 = vpop.eup %173 }
 0x120   :  { %v100_v43 = vmul.f32 %v174_v42, %v98_v41  ;;  %vm106_vm2 = vweird.f32 %v174_v42 }
 0x121   :  { %vm107_vm4 = vmor %vm105_vm3, %vm106_vm2 }
 0x122   :  { %v101_v44 = vmul.f32 %v174_v42, %v100_v43 }
 0x124   :  { %v102_v45 = vmul.f32 0.5, %v101_v44 }
 0x126   :  { %v103_v46 = vsub.f32 1.5, %v102_v45 }
 0x128   :  { %v104_v48 = vmul.f32 %v174_v42, %v103_v46 }
 0x12a   :  { %v108_v49 = vsel %vm107_vm4, %v174_v42, %v104_v48 }
 0x12b   :  { %v109_v50 = vmul.f32 %v108_v49, %v97_v47 }
 0x12d   :  { %112 = vperm.xlu1 %171, %v109_v50  }
 0x135   :  { %124 = vperm.xlu1 %171, %v121_v51  }
 0x19f   :  { %v113_v52 = vpop.permute.xlu1 %112 }
 0x1a0   :  { %v117_v53 = vperm.slane %v113_v52, %v65_v17 }
 0x1a2   :  { %v119_v55 = vmul.f32 %v117_v53, %v68_v21  ;;  %v120_v56 = vmul.f32 %v117_v53, %v69_v22 }
 0x1a7   :  { %v125_v54 = vpop.permute.xlu1 %124 }
 0x1a8   :  { %v129_v57 = vperm.slane %v125_v54, %v65_v17 }
 0x1aa   :  { %v131_v58 = vadd.f32 %v129_v57, %v119_v55  ;;  %v132_v59 = vadd.f32 %v129_v57, %v120_v56 }
 0x1ac   :  { %133 = vst [vmem:[#allocation5] sm:$0xff] %v131_v58 }
 0x1ad   :  { %134 = vst [vmem:[#allocation5 + $0x8] sm:$0xff] %v132_v59 }
 0x1ae   :  { %150 = dma.vmem_to_hbm [thread:$0]  %s143_s6, 256, %s145_s8, [#allocation4], %s228_s23, %s228_s23, %s229_s24  }
 0x1af   :  { %225 = dma.done.wait [#allocation4], 256  }
 0x1b0   :  { %226 = vsyncadd [#allocation4], 4294967040 }
 0x1b1   :  { %163 = vsyncpa [#allocation3], 1 }
 0x1b2   :  { %164 = vsyncpa [#allocation4], 1 }

</bundles_post_ra>
